<compile_context>
chip_gen: v5e
topology: v5e:2x2
jax: 0.10.0
libtpu: 0.0.40
codegen_flags: <defaults>
</compile_context>

<pallas_src>
import functools

import jax
import jax.numpy as jnp
import numpy as np
from jax.experimental import pallas as pl
from jax.experimental.pallas import tpu as pltpu

# Make the pure-JAX reference use full f32 matmul precision so it matches the
# in-kernel MXU accumulation.
jax.config.update("jax_default_matmul_precision", "highest")


def _round_up(x, m):
    return ((x + m - 1) // m) * m


# --------------------------------------------------------------------------- #
# Kernel: the entire MLPBase forward as 3 dependent MXU matmuls.
# --------------------------------------------------------------------------- #
def _mlp_base_kernel(x_ref, w_ref, b_ref, out_ref):
    d_in = x_ref.shape[1]          # true input width (<= P)
    P = out_ref.shape[1]           # padded lane width (multiple of 128)

    x = x_ref[...]                                               # [B, d_in]

    # ---- layer 1: fused actor||critic first layers (one matmul) ----
    h = jnp.tanh(
        jnp.dot(x, w_ref[0:d_in, 0:P], preferred_element_type=jnp.float32)
        + b_ref[:, 0:P]
    )                                                            # [B, P]

    # ---- layer 2: block-diagonal [aw2, cw2] (one matmul) ----
    h = jnp.tanh(
        jnp.dot(h, w_ref[:, P:2 * P], preferred_element_type=jnp.float32)
        + b_ref[:, P:2 * P]
    )                                                            # [B, P]

    # ---- head: identity passthrough of hidden_actor + critic_linear value ----
    # lanes [0:a2) = hidden_actor, lane a2 = value, rest zero padding.
    out_ref[...] = (
        jnp.dot(h, w_ref[:, 2 * P:3 * P], preferred_element_type=jnp.float32)
        + b_ref[:, 2 * P:3 * P]
    )                                                            # [B, P]


# --------------------------------------------------------------------------- #
# Parameter packing (done once, outside the per-step hot path).
# --------------------------------------------------------------------------- #
def pack_params(params, input_dim, actor_hiddens, critic_hiddens):
    a1, a2 = actor_hiddens
    c1, c2 = critic_hiddens
    d1 = a1 + c1
    d2 = a2 + c2
    P = _round_up(max(input_dim, d1, d2, a2 + 1), 128)

    w = np.zeros((P, 3 * P), np.float32)
    b = np.zeros((1, 3 * P), np.float32)

    aw1 = np.asarray(params["aw1"]); ab1 = np.asarray(params["ab1"])
    aw2 = np.asarray(params["aw2"]); ab2 = np.asarray(params["ab2"])
    cw1 = np.asarray(params["cw1"]); cb1 = np.asarray(params["cb1"])
    cw2 = np.asarray(params["cw2"]); cb2 = np.asarray(params["cb2"])
    vw = np.asarray(params["vw"]);   vb = np.asarray(params["vb"])

    # block 0 : layer 1, output lanes [0:a1) actor, [a1:a1+c1) critic
    w[0:input_dim, 0:a1] = aw1
    w[0:input_dim, a1:a1 + c1] = cw1
    b[0, 0:a1] = ab1[0]
    b[0, a1:a1 + c1] = cb1[0]

    # block 1 : layer 2, block-diagonal
    w[0:a1, P:P + a2] = aw2
    w[a1:a1 + c1, P + a2:P + a2 + c2] = cw2
    b[0, P:P + a2] = ab2[0]
    b[0, P + a2:P + a2 + c2] = cb2[0]

    # block 2 : head -> [hidden_actor (identity) | value (critic_linear)]
    w[0:a2, 2 * P:2 * P + a2] = np.eye(a2, dtype=np.float32)
    w[a2:a2 + c2, 2 * P + a2] = vw[:, 0]
    b[0, 2 * P + a2] = vb[0, 0]

    return jnp.asarray(w), jnp.asarray(b)


# --------------------------------------------------------------------------- #
# Wrapper.
# --------------------------------------------------------------------------- #
def make_forward(actor_out):
    """Returns forward(x, masks, w_pack, b_pack) -> (value, hidden_actor)."""

    @jax.jit
    def forward(x, masks, w_pack, b_pack):
        del masks  # MLPBase.forward ignores masks (no recurrence)
        batch = x.shape[0]
        P = w_pack.shape[0]

        vmem = pl.BlockSpec(memory_space=pltpu.MemorySpace.VMEM)
        out = pl.pallas_call(
            _mlp_base_kernel,
            out_shape=jax.ShapeDtypeStruct((batch, P), jnp.float32),
            in_specs=[vmem, vmem, vmem],
            out_specs=vmem,
        )(x, w_pack, b_pack)

        hidden_actor = out[:, :actor_out]              # [B, actor_hiddens[-1]]
        value = out[:, actor_out:actor_out + 1]        # [B, 1]
        return value, hidden_actor

    return forward


# --------------------------------------------------------------------------- #
# Synthetic parameters + pure-JAX reference.
# --------------------------------------------------------------------------- #
def make_params(key, input_dim, actor_hiddens, critic_hiddens):
    """Deterministic synthetic parameters (shapes match the PyTorch module)."""
    ks = jax.random.split(key, 10)
    s = 0.1

    def w(k, shape):
        return (s * jax.random.normal(k, shape)).astype(jnp.float32)

    a1, a2 = actor_hiddens
    c1, c2 = critic_hiddens
    return {
        # actor MLP
        "aw1": w(ks[0], (input_dim, a1)), "ab1": w(ks[1], (1, a1)),
        "aw2": w(ks[2], (a1, a2)),        "ab2": w(ks[3], (1, a2)),
        # critic MLP
        "cw1": w(ks[4], (input_dim, c1)), "cb1": w(ks[5], (1, c1)),
        "cw2": w(ks[6], (c1, c2)),        "cb2": w(ks[7], (1, c2)),
        # critic_linear: critic_hiddens[-1] -> 1
        "vw": w(ks[8], (c2, 1)),          "vb": w(ks[9], (1, 1)),
    }


def _reference_forward(x, p):
    ha = jnp.tanh(x @ p["aw1"] + p["ab1"])
    ha = jnp.tanh(ha @ p["aw2"] + p["ab2"])
    hc = jnp.tanh(x @ p["cw1"] + p["cb1"])
    hc = jnp.tanh(hc @ p["cw2"] + p["cb2"])
    value = hc @ p["vw"] + p["vb"]
    return value, ha


if __name__ == "__main__":
    # Small shapes consistent with the module: obs_space.shape = (32,),
    # actor_hiddens = critic_hiddens = [32, 32], batch = 8.
    batch, input_dim = 8, 32
    actor_hiddens = (32, 32)
    critic_hiddens = (32, 32)

    key = jax.random.PRNGKey(0)
    k_obs, k_par = jax.random.split(key)
    x = jax.random.normal(k_obs, (batch, input_dim), dtype=jnp.float32)
    masks = jnp.ones((batch, 1), dtype=jnp.float32)

    params = make_params(k_par, input_dim, actor_hiddens, critic_hiddens)
    w_pack, b_pack = pack_params(params, input_dim, actor_hiddens, critic_hiddens)

    forward = make_forward(actor_out=actor_hiddens[-1])
    value, hidden_actor = forward(x, masks, w_pack, b_pack)
    jax.block_until_ready((value, hidden_actor))

    rv, rha = _reference_forward(x, params)
    assert value.shape == (batch, 1)
    assert hidden_actor.shape == (batch, actor_hiddens[-1])
    assert np.allclose(np.asarray(value), np.asarray(rv), atol=2e-5)
    assert np.allclose(np.asarray(hidden_actor), np.asarray(rha), atol=2e-5)

    print("KERNEL_OK")
</pallas_src>

<mosaic_0001>
module attributes {stable_mosaic.version = 11 : i64} {
  func.func @_mlp_base_kernel(%arg0: memref<8x32xf32, #tpu.memory_space<vmem>>, %arg1: memref<128x384xf32, #tpu.memory_space<vmem>>, %arg2: memref<1x384xf32, #tpu.memory_space<vmem>>, %arg3: memref<8x128xf32, #tpu.memory_space<vmem>>) attributes {dimension_semantics = [], scalar_prefetch = 0 : i64, scratch_operands = 0 : i64, tpu.core_type = #tpu.core_type<tc>} {
    %c0 = arith.constant 0 : index
    %c0_0 = arith.constant 0 : index
    %0 = vector.load %arg0[%c0, %c0_0] : memref<8x32xf32, #tpu.memory_space<vmem>>, vector<8x32xf32>
    %c0_1 = arith.constant 0 : index
    %c0_2 = arith.constant 0 : index
    %1 = vector.load %arg1[%c0_1, %c0_2] : memref<128x384xf32, #tpu.memory_space<vmem>>, vector<32x128xf32>
    %cst = arith.constant dense<0.000000e+00> : vector<8x128xf32>
    %2 = tpu.matmul %0, %1, %cst {dimension_numbers = #tpu.dot_dimension_numbers<[1], [0], [0], [1], [0, 0, 1, 1], [], []>, precision = #tpu.contract_precision<fp32>} : vector<8x32xf32>, vector<32x128xf32>, vector<8x128xf32> -> vector<8x128xf32>
    %c0_3 = arith.constant 0 : index
    %c0_4 = arith.constant 0 : index
    %3 = vector.load %arg2[%c0_3, %c0_4] : memref<1x384xf32, #tpu.memory_space<vmem>>, vector<1x128xf32>
    %4 = vector.broadcast %3 : vector<1x128xf32> to vector<8x128xf32>
    %5 = arith.addf %2, %4 : vector<8x128xf32>
    %6 = math.tanh %5 : vector<8x128xf32>
    %c0_5 = arith.constant 0 : index
    %c128 = arith.constant 128 : index
    %7 = vector.load %arg1[%c0_5, %c128] : memref<128x384xf32, #tpu.memory_space<vmem>>, vector<128x128xf32>
    %cst_6 = arith.constant dense<0.000000e+00> : vector<8x128xf32>
    %8 = tpu.matmul %6, %7, %cst_6 {dimension_numbers = #tpu.dot_dimension_numbers<[1], [0], [0], [1], [0, 0, 1, 1], [], []>, precision = #tpu.contract_precision<fp32>} : vector<8x128xf32>, vector<128x128xf32>, vector<8x128xf32> -> vector<8x128xf32>
    %c0_7 = arith.constant 0 : index
    %c128_8 = arith.constant 128 : index
    %9 = vector.load %arg2[%c0_7, %c128_8] : memref<1x384xf32, #tpu.memory_space<vmem>>, vector<1x128xf32>
    %10 = vector.broadcast %9 : vector<1x128xf32> to vector<8x128xf32>
    %11 = arith.addf %8, %10 : vector<8x128xf32>
    %12 = math.tanh %11 : vector<8x128xf32>
    %c0_9 = arith.constant 0 : index
    %c256 = arith.constant 256 : index
    %13 = vector.load %arg1[%c0_9, %c256] : memref<128x384xf32, #tpu.memory_space<vmem>>, vector<128x128xf32>
    %cst_10 = arith.constant dense<0.000000e+00> : vector<8x128xf32>
    %14 = tpu.matmul %12, %13, %cst_10 {dimension_numbers = #tpu.dot_dimension_numbers<[1], [0], [0], [1], [0, 0, 1, 1], [], []>, precision = #tpu.contract_precision<fp32>} : vector<8x128xf32>, vector<128x128xf32>, vector<8x128xf32> -> vector<8x128xf32>
    %c0_11 = arith.constant 0 : index
    %c256_12 = arith.constant 256 : index
    %15 = vector.load %arg2[%c0_11, %c256_12] : memref<1x384xf32, #tpu.memory_space<vmem>>, vector<1x128xf32>
    %16 = vector.broadcast %15 : vector<1x128xf32> to vector<8x128xf32>
    %17 = arith.addf %14, %16 : vector<8x128xf32>
    %c0_13 = arith.constant 0 : index
    %c0_14 = arith.constant 0 : index
    %18 = vector.load %arg3[%c0_13, %c0_14] : memref<8x128xf32, #tpu.memory_space<vmem>>, vector<8x128xf32>
    tpu.vector_store %arg3[%c0_13, %c0_14], %17 {strides = array<i32>} : memref<8x128xf32, #tpu.memory_space<vmem>>, vector<8x128xf32>,
    return
  }
}

</mosaic_0001>

<bundles_post_ra>
// kernel: forward.1
= control target key start
LH: loop header
LB: loop body
LE: loop exit
PB: predicated region body
PF: predicated region fallthrough
CT: control target
= control target key end

     0   :  { %8 = vsyncpa [#allocation3], 0  ;;  %s1597_s0 = inlined_call_operand.hbm [shape: f32[8,32], index: 0, kind: input, shape index: {}]   ;;  %s1598_s1 = inlined_call_operand.hbm [shape: f32[128,384], index: 1, kind: input, shape index: {}]   ;;  %s1599_s2 = inlined_call_operand.hbm [shape: f32[1,384], index: 2, kind: input, shape index: {}]   ;;  %s1600_s3 = inlined_call_operand.vmem [shape: f32[8,128], index: 3, kind: output, shape index: {}]  }
   0x1   :  { %9 = vsyncpa [#allocation5], 0  ;;  %s25_s14 = sshll.u32 %s1598_s1, 4  ;;  %s1074_s15 = smov [#allocation4]   ;;  %s26_s14 = int_to_ptr.hbm [resolvable:$true] %s25_s14 }
   0x2   :  { %s27_s16 = sshll.u32 %s1074_s15, 4  ;;  %s15_s19 = sshll.u32 %s1597_s0, 4  ;;  %s28_s16 = int_to_ptr.vmem [resolvable:$true] %s27_s16  ;;  %s16_s19 = int_to_ptr.hbm [resolvable:$true] %s15_s19 }
   0x3   :  { %s1075_s20 = smov 384   ;;  %s1076_s21 = smov 24  }
   0x4   :  { %33 = dma.hbm_to_vmem [thread:$0]  %s26_s14, 6144, %s28_s16, [#allocation5], %s1075_s20, %s1075_s20, %s1076_s21  }
   0x5   :  { %s1077_s22 = smov [#allocation2]   ;;  %s39_s26 = sshll.u32 %s1599_s2, 4  ;;  %s40_s26 = int_to_ptr.hbm [resolvable:$true] %s39_s26 }
   0x6   :  { %s17_s23 = sshll.u32 %s1077_s22, 4  ;;  %s1078_s1 = smov [#allocation6]   ;;  %s18_s23 = int_to_ptr.vmem [resolvable:$true] %s17_s23 }
   0x7   :  { %20 = dma.hbm_to_vmem [thread:$0]  %s16_s19, 128, %s18_s23, [#allocation3]  }
   0x8   :  { %s41_s27 = sshll.u32 %s1078_s1, 4  ;;  %s42_s27 = int_to_ptr.vmem [resolvable:$true] %s41_s27 }
   0x9   :  { %44 = dma.hbm_to_vmem [thread:$0]  %s40_s26, 48, %s42_s27, [#allocation5]  }
   0xa   :  { %1070 = dma.done.wait [#allocation3], 128  }
   0xb   :  { %1071 = vsyncadd [#allocation3], 4294967168 }
   0xc   :  { %1072 = dma.done.wait [#allocation5], 6192  }
   0xd   :  { %1073 = vsyncadd [#allocation5], 4294961104  ;;  %vm66_vm0 = vcmask 261120   ;;  %v61_v0 = vld [vmem:[#allocation4 + $0x48] sm:$0xff]  ;;  %v60_v1 = vld [vmem:[#allocation4 + $0x30] sm:$0xff] }
   0xe   :  { %v59_v2 = vld [vmem:[#allocation4 + $0x18] sm:$0xff]  ;;  %v1108_v3 = vand.u32 4294901760, %v61_v0  ;;  %v1110_v4 = vand.u32 4294901760, %v60_v1  ;;  %v58_v6 = vld [vmem:[#allocation4] sm:$0xff]  ;;  %v271_v8 = vld [vmem:[#allocation4 + $0x170] sm:$0xff] }
   0xf   :  { %v1112_v5 = vand.u32 4294901760, %v59_v2  ;;  %v57_v7 = vld [vmem:[#allocation2] sm:$0xff]  ;;  %v1114_v9 = vand.u32 4294901760, %v58_v6  ;;  %v1116_v11 = vand.u32 4294901760, %v271_v8  ;;  %v269_v13 = vld [vmem:[#allocation4 + $0x140] sm:$0xff]  ;;  %v268_v38 = vld [vmem:[#allocation4 + $0x128] sm:$0xff] }
  0x10   :  { %v68_v10 = vsel %vm66_vm0, %v57_v7, 0  ;;  %v270_v12 = vld [vmem:[#allocation4 + $0x158] sm:$0xff]  ;;  %v112_v14 = vsub.f32 %v61_v0, %v1108_v3  ;;  %83 = vmatpush.msra.mxu0 %v1108_v3  ;;  %v1121_v15 = vsub.f32 %v60_v1, %v1110_v4  ;;  %183 = vmatpush.msra.mxu3 %v1108_v3  ;;  %v1137_v21 = vand.u32 4294901760, %v269_v13  ;;  %v267_v39 = vld [vmem:[#allocation4 + $0x110] sm:$0xff]  ;;  %v265_v44 = vld [vmem:[#allocation4 + $0xe0] sm:$0xff] }
  0x11   :  { %v1125_v16 = vsub.f32 %v59_v2, %v1112_v5  ;;  %v1127_v17 = vand.u32 4294901760, %v68_v10  ;;  %v1130_v18 = vsub.f32 %v58_v6, %v1114_v9  ;;  %v1133_v19 = vsub.f32 %v271_v8, %v1116_v11  ;;  %v266_v40 = vld [vmem:[#allocation4 + $0xf8] sm:$0xff]  ;;  %v264_v45 = vld [vmem:[#allocation4 + $0xc8] sm:$0xff]  ;;  %v263_v50 = vld [vmem:[#allocation4 + $0xb0] sm:$0xff] }
  0x12   :  { %v1135_v20 = vand.u32 4294901760, %v270_v12  ;;  %154 = vmatpush.msra.mxu2 %v112_v14  ;;  %85 = vmatpush.msra.mxu0 %v1110_v4  ;;  %v113_v22 = vand.u32 4294901760, %v112_v14  ;;  %v119_v23 = vand.u32 4294901760, %v1121_v15  ;;  %v1150_v29 = vsub.f32 %v269_v13, %v1137_v21  ;;  %v262_v55 = vld [vmem:[#allocation4 + $0x98] sm:$0xff]  ;;  %v261_v60 = vld [vmem:[#allocation4 + $0x80] sm:$0xff] }
  0x13   :  { %v91_v24 = vsub.f32 %v68_v10, %v1127_v17  ;;  %v125_v25 = vand.u32 4294901760, %v1125_v16  ;;  %185 = vmatpush.msra.mxu3 %v1110_v4  ;;  %v131_v26 = vand.u32 4294901760, %v1130_v18  ;;  %v319_v27 = vand.u32 4294901760, %v1133_v19 }
  0x14   :  { %v1147_v28 = vsub.f32 %v270_v12, %v1135_v20  ;;  %157 = vmatpush.msra.mxu2 %v1121_v15  ;;  %v114_v30 = vsub.f32 %v112_v14, %v113_v22  ;;  %87 = vmatpush.msra.mxu0 %v1112_v5  ;;  %v120_v31 = vsub.f32 %v1121_v15, %v119_v23  ;;  %v331_v37 = vand.u32 4294901760, %v1150_v29 }
  0x15   :  { %v126_v32 = vsub.f32 %v1125_v16, %v125_v25  ;;  %v92_v33 = vand.u32 4294901760, %v91_v24  ;;  %187 = vmatpush.msra.mxu3 %v1112_v5  ;;  %v132_v34 = vsub.f32 %v1130_v18, %v131_v26  ;;  %v320_v35 = vsub.f32 %v1133_v19, %v319_v27 }
  0x16   :  { %v325_v36 = vand.u32 4294901760, %v1147_v28  ;;  %v115_v41 = vand.u32 4294901760, %v114_v30  ;;  %160 = vmatpush.msra.mxu2 %v1125_v16  ;;  %v121_v42 = vand.u32 4294901760, %v120_v31  ;;  %89 = vmatpush.msra.mxu0 %v1114_v9  ;;  %v332_v49 = vsub.f32 %v1150_v29, %v331_v37  ;;  %v260_v30 = vld [vmem:[#allocation4 + $0x68] sm:$0xff]  ;;  %v259_v31 = vld [vmem:[#allocation4 + $0x50] sm:$0xff] }
  0x17   :  { %v93_v43 = vsub.f32 %v91_v24, %v92_v33  ;;  %v127_v46 = vand.u32 4294901760, %v126_v32  ;;  %189 = vmatpush.msra.mxu3 %v1114_v9  ;;  %v321_v47 = vand.u32 4294901760, %v320_v35  ;;  %v1177_v52 = vand.u32 4294901760, %v268_v38 }
  0x18   :  { %212 = vmatpush.msrb.mxu0 %v113_v22  ;;  %v326_v48 = vsub.f32 %v1147_v28, %v325_v36  ;;  %116 = vmatpush.msra.mxu1 %v115_v41  ;;  %v1179_v53 = vand.u32 4294901760, %v267_v39  ;;  %v1181_v54 = vand.u32 4294901760, %v266_v40  ;;  %v133_v56 = vand.u32 4294901760, %v132_v34  ;;  %v258_v34 = vld [vmem:[#allocation4 + $0x38] sm:$0xff] }
  0x19   :  { %163 = vmatpush.msra.mxu2 %v1130_v18  ;;  %v94_v51 = vand.u32 4294901760, %v93_v43  ;;  %193 = vmatmul.f32.vlgmr.msra.gmra.mxu3 %v92_v33  ;;  %v1183_v58 = vand.u32 4294901760, %v265_v44  ;;  %v1185_v59 = vand.u32 4294901760, %v264_v45  ;;  %v1188_v61 = vsub.f32 %v268_v38, %v1177_v52 }
  0x1a   :  { %166 = vmatmul.f32.vlgmr.msra.gmra.mxu2 %v91_v24  ;;  %v327_v57 = vand.u32 4294901760, %v326_v48  ;;  %122 = vmatpush.msra.mxu1 %v121_v42  ;;  %v1191_v62 = vsub.f32 %v267_v39, %v1179_v53  ;;  %v1194_v63 = vsub.f32 %v266_v40, %v1181_v54  ;;  %v1196_v0 = vand.u32 4294901760, %v263_v50  ;;  %v257_v40 = vld [vmem:[#allocation4 + $0x20] sm:$0xff] }
  0x1b   :  { %95 = vmatmul.f32.vlgmr.msra.gmra.mxu0 %v94_v51  ;;  %322 = vmatpush.msrb.mxu3 %v321_v47  ;;  %v333_v1 = vand.u32 4294901760, %v332_v49  ;;  %v1199_v2 = vsub.f32 %v265_v44, %v1183_v58  ;;  %v1202_v6 = vsub.f32 %v264_v45, %v1185_v59  ;;  %v1204_v7 = vand.u32 4294901760, %v262_v55  ;;  %v256_v45 = vld [vmem:[#allocation4 + $0x8] sm:$0xff] }
  0x1c   :  { %216 = vmatpush.msrb.mxu0 %v119_v23  ;;  %128 = vmatpush.msra.mxu1 %v127_v46  ;;  %v337_v8 = vand.u32 4294901760, %v1188_v61  ;;  %v343_v10 = vand.u32 4294901760, %v1191_v62  ;;  %v349_v12 = vand.u32 4294901760, %v1194_v63  ;;  %v1210_v13 = vand.u32 4294901760, %v261_v60 }
  0x1d   :  { %277 = vmatpush.msrb.mxu2 %v1116_v11  ;;  %328 = vmatpush.msrb.mxu3 %v327_v57  ;;  %v355_v14 = vand.u32 4294901760, %v1199_v2  ;;  %v1216_v15 = vsub.f32 %v263_v50, %v1196_v0  ;;  %v361_v16 = vand.u32 4294901760, %v1202_v6  ;;  %v1250_v38 = vand.u32 4294901760, %v260_v30 }
  0x1e   :  { %220 = vmatpush.msrb.mxu0 %v125_v25  ;;  %134 = vmatpush.msra.mxu1 %v133_v56  ;;  %v338_v22 = vsub.f32 %v1188_v61, %v337_v8  ;;  %v344_v23 = vsub.f32 %v1191_v62, %v343_v10  ;;  %v350_v24 = vsub.f32 %v1194_v63, %v349_v12  ;;  %v1252_v39 = vand.u32 4294901760, %v259_v31 }
  0x1f   :  { %279 = vmatpush.msrb.mxu2 %v1135_v20  ;;  %136 = vmatmul.f32.vlgmr.msra.gmra.mxu1 %v1127_v17  ;;  %v1233_v25 = vsub.f32 %v262_v55, %v1204_v7  ;;  %v1237_v33 = vsub.f32 %v261_v60, %v1210_v13  ;;  %v356_v18 = vsub.f32 %v1199_v2, %v355_v14  ;;  %v1256_v43 = vand.u32 4294901760, %v258_v34 }
  0x20   :  { %224 = vmatpush.msrb.mxu0 %v131_v26  ;;  %243 = vmatpush.msrb.mxu1 %v1108_v3  ;;  %v339_v32 = vand.u32 4294901760, %v338_v22  ;;  %v345_v35 = vand.u32 4294901760, %v344_v23  ;;  %v367_v26 = vand.u32 4294901760, %v1216_v15  ;;  %v362_v3 = vsub.f32 %v1202_v6, %v361_v16 }
  0x21   :  { %334 = vmatpush.msrb.mxu3 %v333_v1  ;;  %281 = vmatpush.msrb.mxu2 %v1137_v21  ;;  %v351_v41 = vand.u32 4294901760, %v350_v24  ;;  %v373_v42 = vand.u32 4294901760, %v1233_v25  ;;  %v1261_v44 = vsub.f32 %v260_v30, %v1250_v38  ;;  %v357_v46 = vand.u32 4294901760, %v356_v18 }
  0x22   :  { %420 = vmatpush.msra.mxu0 %v1133_v19  ;;  %245 = vmatpush.msrb.mxu1 %v1110_v4  ;;  %v379_v4 = vand.u32 4294901760, %v1237_v33  ;;  %v368_v47 = vsub.f32 %v1216_v15, %v367_v26  ;;  %v1269_v48 = vsub.f32 %v259_v31, %v1252_v39  ;;  %v363_v49 = vand.u32 4294901760, %v362_v3 }
  0x23   :  { %226 = vmatmul.f32.vlgmr.msrb.gmra.mxu0 %v1127_v17  ;;  %340 = vmatpush.msrb.mxu3 %v339_v32  ;;  %v374_v50 = vsub.f32 %v1233_v25, %v373_v42  ;;  %v385_v51 = vand.u32 4294901760, %v1261_v44  ;;  %v1281_v55 = vsub.f32 %v258_v34, %v1256_v43  ;;  %v1283_v56 = vand.u32 4294901760, %v256_v45 }
  0x24   :  { %283 = vmatpush.msrb.mxu2 %v1177_v52  ;;  %247 = vmatpush.msrb.mxu1 %v1112_v5  ;;  %v1271_v5 = vand.u32 4294901760, %v257_v40  ;;  %v391_v57 = vand.u32 4294901760, %v1269_v48 }
  0x25   :  { %423 = vmatpush.msra.mxu0 %v1147_v28  ;;  %346 = vmatpush.msrb.mxu3 %v345_v35  ;;  %v375_v1 = vand.u32 4294901760, %v374_v50  ;;  %v386_v22 = vsub.f32 %v1261_v44, %v385_v51  ;;  %v397_v23 = vand.u32 4294901760, %v1281_v55  ;;  %v1302_v24 = vsub.f32 %v256_v45, %v1283_v56 }
  0x26   :  { %285 = vmatpush.msrb.mxu2 %v1179_v53  ;;  %249 = vmatpush.msrb.mxu1 %v1114_v9  ;;  %v369_v9 = vand.u32 4294901760, %v368_v47  ;;  %v1292_v60 = vsub.f32 %v257_v40, %v1271_v5  ;;  %v392_v31 = vsub.f32 %v1269_v48, %v391_v57 }
  0x27   :  { %426 = vmatpush.msra.mxu0 %v1150_v29  ;;  %251 = vmatmul.f32.vlgmr.msrb.gmra.mxu1 %v1127_v17  ;;  %v380_v17 = vsub.f32 %v1237_v33, %v379_v4  ;;  %v387_v34 = vand.u32 4294901760, %v386_v22  ;;  %v398_v35 = vsub.f32 %v1281_v55, %v397_v23  ;;  %v409_v18 = vand.u32 4294901760, %v1302_v24 }
  0x28   :  { %352 = vmatpush.msrb.mxu3 %v351_v41  ;;  %287 = vmatpush.msrb.mxu2 %v1181_v54  ;;  %v403_v32 = vand.u32 4294901760, %v1292_v60  ;;  %v393_v3 = vand.u32 4294901760, %v392_v31 }
  0x29   :  { %473 = vmatpush.msra.mxu1 %v1116_v11  ;;  %429 = vmatpush.msra.mxu0 %v1188_v61  ;;  %v381_v30 = vand.u32 4294901760, %v380_v17  ;;  %v399_v41 = vand.u32 4294901760, %v398_v35  ;;  %v410_v45 = vsub.f32 %v1302_v24, %v409_v18  ;;  %v624_v17 = vld [vmem:[#allocation4 + $0xa0] sm:$0xff] }
  0x2a   :  { %358 = vmatpush.msrb.mxu3 %v357_v46  ;;  %289 = vmatpush.msrb.mxu2 %v1183_v58  ;;  %v404_v40 = vsub.f32 %v1292_v60, %v403_v32 }
  0x2b   :  { %475 = vmatpush.msra.mxu1 %v1135_v20  ;;  %432 = vmatpush.msra.mxu0 %v1191_v62  ;;  %v411_v47 = vand.u32 4294901760, %v410_v45 }
  0x2c   :  { %364 = vmatpush.msrb.mxu3 %v363_v49  ;;  %291 = vmatpush.msrb.mxu2 %v1185_v59  ;;  %v405_v46 = vand.u32 4294901760, %v404_v40  ;;  %v626_v49 = vld [vmem:[#allocation4 + $0xd0] sm:$0xff] }
  0x2d   :  { %477 = vmatpush.msra.mxu1 %v1137_v21  ;;  %435 = vmatpush.msra.mxu0 %v1194_v63  ;;  %v630_v63 = vld [vmem:[#allocation4 + $0x130] sm:$0xff]  ;;  %v1458_v22 = vand.u32 4294901760, %v626_v49 }
  0x2e   :  { %370 = vmatpush.msrb.mxu3 %v369_v9  ;;  %293 = vmatpush.msrb.mxu2 %v1196_v0  ;;  %v625_v9 = vld [vmem:[#allocation4 + $0xb8] sm:$0xff] }
  0x2f   :  { %479 = vmatpush.msra.mxu1 %v1177_v52  ;;  %438 = vmatpush.msra.mxu0 %v1199_v2  ;;  %v628_v2 = vld [vmem:[#allocation4 + $0x100] sm:$0xff]  ;;  %v1465_v31 = vsub.f32 %v626_v49, %v1458_v22  ;;  %v621_v49 = vld [vmem:[#allocation4 + $0x58] sm:$0xff] }
  0x30   :  { %376 = vmatpush.msrb.mxu3 %v375_v1  ;;  %295 = vmatpush.msrb.mxu2 %v1204_v7 }
  0x31   :  { %481 = vmatpush.msra.mxu1 %v1179_v53  ;;  %441 = vmatpush.msra.mxu0 %v1202_v6  ;;  %v1407_v6 = vand.u32 4294901760, %v630_v63  ;;  %v723_v40 = vand.u32 4294901760, %v1465_v31 }
  0x32   :  { %382 = vmatpush.msrb.mxu3 %v381_v30  ;;  %297 = vmatpush.msrb.mxu2 %v1210_v13 }
  0x33   :  { %483 = vmatpush.msra.mxu1 %v1181_v54  ;;  %444 = vmatpush.msra.mxu0 %v1216_v15 }
  0x34   :  { %388 = vmatpush.msrb.mxu3 %v387_v34  ;;  %299 = vmatpush.msrb.mxu2 %v1250_v38  ;;  %v1470_v34 = vand.u32 4294901760, %v624_v17 }
  0x35   :  { %485 = vmatpush.msra.mxu1 %v1183_v58  ;;  %447 = vmatpush.msra.mxu0 %v1233_v25  ;;  %v1424_v25 = vsub.f32 %v630_v63, %v1407_v6 }
  0x36   :  { %394 = vmatpush.msrb.mxu3 %v393_v3  ;;  %301 = vmatpush.msrb.mxu2 %v1252_v39  ;;  %v1481_v45 = vsub.f32 %v624_v17, %v1470_v34 }
  0x37   :  { %487 = vmatpush.msra.mxu1 %v1185_v59  ;;  %450 = vmatpush.msra.mxu0 %v1237_v33 }
  0x38   :  { %400 = vmatpush.msrb.mxu3 %v399_v41  ;;  %303 = vmatpush.msrb.mxu2 %v1256_v43 }
  0x39   :  { %489 = vmatpush.msra.mxu1 %v1196_v0  ;;  %453 = vmatpush.msra.mxu0 %v1261_v44  ;;  %v699_v44 = vand.u32 4294901760, %v1424_v25 }
  0x3a   :  { %406 = vmatpush.msrb.mxu3 %v405_v46  ;;  %305 = vmatpush.msrb.mxu2 %v1271_v5 }
  0x3b   :  { %491 = vmatpush.msra.mxu1 %v1204_v7  ;;  %456 = vmatpush.msra.mxu0 %v1269_v48  ;;  %v700_v1 = vsub.f32 %v1424_v25, %v699_v44 }
  0x3c   :  { %412 = vmatpush.msrb.mxu3 %v411_v47  ;;  %307 = vmatpush.msrb.mxu2 %v1283_v56 }
  0x3d   :  { %493 = vmatpush.msra.mxu1 %v1210_v13  ;;  %459 = vmatpush.msra.mxu0 %v1281_v55  ;;  %v701_v3 = vand.u32 4294901760, %v700_v1 }
  0x3e   :  { %581 = vmatpush.msra.mxu3 %v1116_v11  ;;  %514 = vmatpush.msra.mxu2 %v319_v27  ;;  %v991_v11 = vld [vmem:[#allocation6] ss:$0 sm:$0xff] }
  0x3f   :  { %495 = vmatpush.msra.mxu1 %v1250_v38  ;;  %462 = vmatpush.msra.mxu0 %v1292_v60 }
  0x40   :  { %583 = vmatpush.msra.mxu3 %v1135_v20  ;;  %518 = vmatpush.msra.mxu2 %v325_v36 }
  0x41   :  { %497 = vmatpush.msra.mxu1 %v1252_v39  ;;  %465 = vmatpush.msra.mxu0 %v1302_v24 }
  0x42   :  { %585 = vmatpush.msra.mxu3 %v1137_v21  ;;  %522 = vmatpush.msra.mxu2 %v331_v37 }
  0x43   :  { %499 = vmatpush.msra.mxu1 %v1256_v43 }
  0x44   :  { %587 = vmatpush.msra.mxu3 %v1177_v52  ;;  %526 = vmatpush.msra.mxu2 %v337_v8  ;;  %v633_v52 = vld [vmem:[#allocation4 + $0x178] sm:$0xff]  ;;  %v1411_v8 = vand.u32 4294901760, %v628_v2 }
  0x45   :  { %501 = vmatpush.msra.mxu1 %v1271_v5 }
  0x46   :  { %589 = vmatpush.msra.mxu3 %v1179_v53  ;;  %530 = vmatpush.msra.mxu2 %v343_v10  ;;  %v632_v53 = vld [vmem:[#allocation4 + $0x160] sm:$0xff]  ;;  %v627_v10 = vld [vmem:[#allocation4 + $0xe8] sm:$0xff] }
  0x47   :  { %503 = vmatpush.msra.mxu1 %v1283_v56  ;;  %v1403_v61 = vand.u32 4294901760, %v632_v53 }
  0x48   :  { %591 = vmatpush.msra.mxu3 %v1181_v54  ;;  %534 = vmatpush.msra.mxu2 %v349_v12  ;;  %v631_v54 = vld [vmem:[#allocation4 + $0x148] sm:$0xff] }
  0x49   :  { %v1405_v62 = vand.u32 4294901760, %v631_v54 }
  0x4a   :  { %593 = vmatpush.msra.mxu3 %v1183_v58  ;;  %538 = vmatpush.msra.mxu2 %v355_v14  ;;  %v1417_v14 = vsub.f32 %v632_v53, %v1403_v61 }
  0x4b   :  { %v1420_v15 = vsub.f32 %v631_v54, %v1405_v62 }
  0x4c   :  { %595 = vmatpush.msra.mxu3 %v1185_v59  ;;  %542 = vmatpush.msra.mxu2 %v361_v16  ;;  %v1401_v59 = vand.u32 4294901760, %v633_v52 }
  0x4e   :  { %597 = vmatpush.msra.mxu3 %v1196_v0  ;;  %546 = vmatpush.msra.mxu2 %v367_v26  ;;  %v629_v0 = vld [vmem:[#allocation4 + $0x118] sm:$0xff]  ;;  %v1430_v26 = vsub.f32 %v628_v2, %v1411_v8  ;;  %v623_v2 = vld [vmem:[#allocation4 + $0x88] sm:$0xff] }
  0x4f   :  { %639 = vmatpush.msrb.mxu0 %v1401_v59 }
  0x50   :  { %599 = vmatpush.msra.mxu3 %v1204_v7  ;;  %550 = vmatpush.msra.mxu2 %v373_v42  ;;  %v1409_v7 = vand.u32 4294901760, %v629_v0 }
  0x51   :  { %641 = vmatpush.msrb.mxu0 %v1403_v61 }
  0x52   :  { %601 = vmatpush.msra.mxu3 %v1210_v13  ;;  %554 = vmatpush.msra.mxu2 %v379_v4  ;;  %v1414_v13 = vsub.f32 %v633_v52, %v1401_v59  ;;  %v1427_v33 = vsub.f32 %v629_v0, %v1409_v7  ;;  %v693_v4 = vand.u32 4294901760, %v1420_v15 }
  0x53   :  { %643 = vmatpush.msrb.mxu0 %v1405_v62 }
  0x54   :  { %603 = vmatpush.msra.mxu3 %v1250_v38  ;;  %558 = vmatpush.msra.mxu2 %v385_v51  ;;  %v1432_v38 = vand.u32 4294901760, %v627_v10  ;;  %v681_v42 = vand.u32 4294901760, %v1414_v13  ;;  %v705_v48 = vand.u32 4294901760, %v1427_v33  ;;  %v694_v55 = vsub.f32 %v1420_v15, %v693_v4 }
  0x55   :  { %645 = vmatpush.msrb.mxu0 %v1407_v6 }
  0x56   :  { %605 = vmatpush.msra.mxu3 %v1252_v39  ;;  %562 = vmatpush.msra.mxu2 %v391_v57  ;;  %v682_v50 = vsub.f32 %v1414_v13, %v681_v42  ;;  %v695_v30 = vand.u32 4294901760, %v694_v55  ;;  %v1534_v55 = vand.u32 4294901760, %v621_v49 }
  0x57   :  { %647 = vmatpush.msrb.mxu0 %v1409_v7 }
  0x58   :  { %607 = vmatpush.msra.mxu3 %v1256_v43  ;;  %566 = vmatpush.msra.mxu2 %v397_v23  ;;  %v687_v43 = vand.u32 4294901760, %v1417_v14  ;;  %v683_v57 = vand.u32 4294901760, %v682_v50  ;;  %v706_v23 = vsub.f32 %v1427_v33, %v705_v48 }
  0x59   :  { %649 = vmatpush.msrb.mxu0 %v1411_v8 }
  0x5a   :  { %609 = vmatpush.msra.mxu3 %v1271_v5  ;;  %570 = vmatpush.msra.mxu2 %v403_v32  ;;  %v1441_v5 = vsub.f32 %v627_v10, %v1432_v38  ;;  %v688_v51 = vsub.f32 %v1417_v14, %v687_v43  ;;  %v1468_v32 = vand.u32 4294901760, %v625_v9  ;;  %v707_v47 = vand.u32 4294901760, %v706_v23  ;;  %v619_v23 = vld [vmem:[#allocation4 + $0x28] sm:$0xff] }
  0x5b   :  { %684 = vmatpush.msrb.mxu1 %v683_v57  ;;  %651 = vmatpush.msrb.mxu0 %v1432_v38  ;;  %v1521_v10 = vand.u32 4294901760, %v623_v2 }
  0x5c   :  { %611 = vmatpush.msra.mxu3 %v1283_v56  ;;  %574 = vmatpush.msra.mxu2 %v409_v18  ;;  %v711_v56 = vand.u32 4294901760, %v1430_v26  ;;  %v689_v60 = vand.u32 4294901760, %v688_v51  ;;  %v717_v24 = vand.u32 4294901760, %v1441_v5  ;;  %v1477_v41 = vsub.f32 %v625_v9, %v1468_v32  ;;  %v620_v9 = vld [vmem:[#allocation4 + $0x40] sm:$0xff] }
  0x5d   :  { %653 = vmatpush.msrb.mxu0 %v1458_v22  ;;  %v1546_v1 = vand.u32 4294901760, %v620_v9 }
  0x5e   :  { %v712_v35 = vsub.f32 %v1430_v26, %v711_v56  ;;  %690 = vmatpush.msrb.mxu1 %v689_v60  ;;  %v1544_v60 = vsub.f32 %v621_v49, %v1534_v55 }
  0x5f   :  { %655 = vmatpush.msrb.mxu0 %v1468_v32 }
  0x60   :  { %696 = vmatpush.msrb.mxu1 %v695_v30 }
  0x61   :  { %657 = vmatpush.msrb.mxu0 %v1470_v34 }
  0x62   :  { %702 = vmatpush.msrb.mxu1 %v701_v3  ;;  %v758_v3 = vsub.f32 %v620_v9, %v1546_v1 }
  0x63   :  { %659 = vmatpush.msrb.mxu0 %v1521_v10 }
  0x64   :  { %708 = vmatpush.msrb.mxu1 %v707_v47  ;;  %v618_v47 = vld [vmem:[#allocation4 + $0x10] sm:$0xff] }
  0x98   :  { %v96_v19 = vpop.f32.mrf.mxu0 }
  0x99   :  { %v97_v20 = vadd.f32 %v991_v11, %v96_v19  ;;  %v718_v11 = vsub.f32 %v1441_v5, %v717_v24  ;;  %v729_v19 = vand.u32 4294901760, %v1477_v41 }
  0x9c   :  { %v137_v21 = vpop.f32.mrf.mxu1  ;;  %v194_v29 = vpop.f32.mrf.mxu3 }
  0x9d   :  { %v167_v27 = vpop.f32.mrf.mxu2  ;;  %v138_v28 = vadd.f32 %v137_v21, %v97_v20  ;;  %v713_v21 = vand.u32 4294901760, %v712_v35 }
  0x9f   :  { %v168_v36 = vadd.f32 %v167_v27, %v138_v28  ;;  %v724_v27 = vsub.f32 %v1465_v31, %v723_v40  ;;  %v735_v28 = vand.u32 4294901760, %v1481_v45  ;;  %714 = vmatpush.msrb.mxu1 %v713_v21  ;;  %v759_v21 = vand.u32 4294901760, %v758_v3 }
  0xa0   :  { %v227_v37 = vpop.f32.mrf.mxu0 }
  0xa1   :  { %v195_v58 = vadd.f32 %v194_v29, %v168_v36  ;;  %v719_v36 = vand.u32 4294901760, %v718_v11  ;;  %v725_v53 = vand.u32 4294901760, %v724_v27  ;;  %v736_v54 = vsub.f32 %v1481_v45, %v735_v28 }
  0xa2   :  { %v668_v27 = vand.u32 4294901760, %v618_v47 }
  0xa3   :  { %v228_v12 = vadd.f32 %v227_v37, %v195_v58  ;;  %v730_v37 = vsub.f32 %v1477_v41, %v729_v19  ;;  %720 = vmatpush.msrb.mxu1 %v719_v36  ;;  %v737_v0 = vand.u32 4294901760, %v736_v54 }
  0xa4   :  { %v252_v16 = vpop.f32.mrf.mxu1 }
  0xa5   :  { %v253_v39 = vadd.f32 %v252_v16, %v228_v12  ;;  %v731_v63 = vand.u32 4294901760, %v730_v37  ;;  %726 = vmatpush.msrb.mxu1 %v725_v53  ;;  %v622_v12 = vld [vmem:[#allocation4 + $0x70] sm:$0xff]  ;;  %v1524_v16 = vsub.f32 %v623_v2, %v1521_v10  ;;  %v760_v37 = vsub.f32 %v758_v3, %v759_v21 }
  0xa7   :  { %994 = vtanh.f32 %v253_v39  ;;  %732 = vmatpush.msrb.mxu1 %v731_v63  ;;  %v1526_v39 = vand.u32 4294901760, %v622_v12  ;;  %v741_v50 = vand.u32 4294901760, %v1524_v16  ;;  %v761_v54 = vand.u32 4294901760, %v760_v37 }
  0xa9   :  { %738 = vmatpush.msrb.mxu1 %v737_v0  ;;  %v1532_v51 = vsub.f32 %v622_v12, %v1526_v39  ;;  %661 = vmatpush.msrb.mxu0 %v1526_v39  ;;  %v742_v17 = vsub.f32 %v1524_v16, %v741_v50 }
  0xab   :  { %v747_v57 = vand.u32 4294901760, %v1532_v51  ;;  %663 = vmatpush.msrb.mxu0 %v1534_v55  ;;  %v743_v30 = vand.u32 4294901760, %v742_v17 }
  0xad   :  { %v995_v18 = vpop.eup %994  ;;  %v748_v35 = vsub.f32 %v1532_v51, %v747_v57  ;;  %665 = vmatpush.msrb.mxu0 %v1546_v1  ;;  %744 = vmatpush.msrb.mxu1 %v743_v30 }
  0xae   :  { %v308_v46 = vand.u32 4294901760, %v995_v18 }
  0xaf   :  { %v749_v11 = vand.u32 4294901760, %v748_v35 }
  0xb0   :  { %414 = vmatmul.f32.vlgmr.msrb.gmra.mxu3 %v308_v46  ;;  %v309_v20 = vsub.f32 %v995_v18, %v308_v46  ;;  %v753_v18 = vand.u32 4294901760, %v1544_v60 }
  0xb1   :  { %835 = vmatpush.msrb.mxu3 %v1401_v59  ;;  %750 = vmatpush.msrb.mxu1 %v749_v11 }
  0xb2   :  { %468 = vmatmul.f32.vlgmr.msra.gmra.mxu0 %v309_v20  ;;  %v310_v29 = vand.u32 4294901760, %v309_v20 }
  0xb3   :  { %837 = vmatpush.msrb.mxu3 %v1403_v61 }
  0xb4   :  { %507 = vmatmul.f32.vlgmr.msra.gmra.mxu1 %v310_v29  ;;  %v311_v52 = vsub.f32 %v309_v20, %v310_v29  ;;  %v754_v20 = vsub.f32 %v1544_v60, %v753_v18 }
  0xb5   :  { %839 = vmatpush.msrb.mxu3 %v1405_v62 }
  0xb6   :  { %v312_v58 = vand.u32 4294901760, %v311_v52  ;;  %v755_v36 = vand.u32 4294901760, %v754_v20  ;;  %v770_v52 = vsub.f32 %v618_v47, %v668_v27 }
  0xb7   :  { %841 = vmatpush.msrb.mxu3 %v1407_v6 }
  0xb8   :  { %313 = vmatmul.f32.vlgmr.msrb.gmra.mxu2 %v312_v58  ;;  %613 = vmatmul.f32.vlgmr.msra.gmra.mxu3 %v308_v46  ;;  %v771_v58 = vand.u32 4294901760, %v770_v52 }
  0xb9   :  { %782 = vmatpush.msrb.mxu2 %v1414_v13  ;;  %843 = vmatpush.msrb.mxu3 %v1409_v7 }
  0xba   :  { %756 = vmatpush.msrb.mxu1 %v755_v36  ;;  %v772_v0 = vsub.f32 %v770_v52, %v771_v58 }
  0xbb   :  { %785 = vmatpush.msrb.mxu2 %v1417_v14  ;;  %845 = vmatpush.msrb.mxu3 %v1411_v8 }
  0xbc   :  { %762 = vmatpush.msrb.mxu1 %v761_v54  ;;  %v773_v12 = vand.u32 4294901760, %v772_v0 }
  0xbd   :  { %788 = vmatpush.msrb.mxu2 %v1420_v15  ;;  %847 = vmatpush.msrb.mxu3 %v1432_v38 }
  0xbf   :  { %791 = vmatpush.msrb.mxu2 %v1424_v25  ;;  %849 = vmatpush.msrb.mxu3 %v1458_v22 }
  0xc0   :  { %576 = vmatmul.f32.vlgmr.msra.gmra.mxu2 %v308_v46  ;;  %v666_v46 = vand.u32 4294901760, %v619_v23 }
  0xc1   :  { %794 = vmatpush.msrb.mxu2 %v1427_v33  ;;  %851 = vmatpush.msrb.mxu3 %v1468_v32 }
  0xc2   :  { %v764_v29 = vsub.f32 %v619_v23, %v666_v46  ;;  %667 = vmatpush.msrb.mxu0 %v666_v46 }
  0xc3   :  { %797 = vmatpush.msrb.mxu2 %v1430_v26  ;;  %853 = vmatpush.msrb.mxu3 %v1470_v34 }
  0xc4   :  { %v765_v53 = vand.u32 4294901760, %v764_v29  ;;  %669 = vmatpush.msrb.mxu0 %v668_v27 }
  0xc5   :  { %800 = vmatpush.msrb.mxu2 %v1441_v5  ;;  %855 = vmatpush.msrb.mxu3 %v1521_v10 }
  0xc6   :  { %876 = vmatpush.msra.mxu0 %v681_v42  ;;  %v766_v63 = vsub.f32 %v764_v29, %v765_v53 }
  0xc7   :  { %803 = vmatpush.msrb.mxu2 %v1465_v31  ;;  %857 = vmatpush.msrb.mxu3 %v1526_v39 }
  0xc8   :  { %880 = vmatpush.msra.mxu0 %v687_v43  ;;  %v767_v2 = vand.u32 4294901760, %v766_v63 }
  0xc9   :  { %806 = vmatpush.msrb.mxu2 %v1477_v41  ;;  %859 = vmatpush.msrb.mxu3 %v1534_v55 }
  0xca   :  { %884 = vmatpush.msra.mxu0 %v693_v4  ;;  %768 = vmatpush.msrb.mxu1 %v767_v2 }
  0xcb   :  { %809 = vmatpush.msrb.mxu2 %v1481_v45  ;;  %861 = vmatpush.msrb.mxu3 %v1546_v1 }
  0xcc   :  { %888 = vmatpush.msra.mxu0 %v699_v44  ;;  %774 = vmatpush.msrb.mxu1 %v773_v12 }
  0xcd   :  { %812 = vmatpush.msrb.mxu2 %v1524_v16  ;;  %863 = vmatpush.msrb.mxu3 %v666_v46 }
  0xce   :  { %943 = vmatpush.msra.mxu1 %v1401_v59  ;;  %892 = vmatpush.msra.mxu0 %v705_v48  ;;  %v992_v59 = vld [vmem:[#allocation6 + $0x1] ss:$0 sm:$0xff] }
  0xcf   :  { %815 = vmatpush.msrb.mxu2 %v1532_v51  ;;  %865 = vmatpush.msrb.mxu3 %v668_v27 }
  0xd0   :  { %945 = vmatpush.msra.mxu1 %v1403_v61  ;;  %896 = vmatpush.msra.mxu0 %v711_v56  ;;  %v993_v56 = vld [vmem:[#allocation6 + $0x2] ss:$0 sm:$0xff] }
  0xd1   :  { %818 = vmatpush.msrb.mxu2 %v1544_v60 }
  0xd2   :  { %947 = vmatpush.msra.mxu1 %v1405_v62  ;;  %900 = vmatpush.msra.mxu0 %v717_v24 }
  0xd3   :  { %821 = vmatpush.msrb.mxu2 %v758_v3 }
  0xd4   :  { %949 = vmatpush.msra.mxu1 %v1407_v6  ;;  %904 = vmatpush.msra.mxu0 %v723_v40 }
  0xd5   :  { %824 = vmatpush.msrb.mxu2 %v764_v29 }
  0xd6   :  { %951 = vmatpush.msra.mxu1 %v1409_v7  ;;  %908 = vmatpush.msra.mxu0 %v729_v19 }
  0xd7   :  { %827 = vmatpush.msrb.mxu2 %v770_v52 }
  0xd8   :  { %953 = vmatpush.msra.mxu1 %v1411_v8  ;;  %912 = vmatpush.msra.mxu0 %v735_v28 }
  0xda   :  { %955 = vmatpush.msra.mxu1 %v1432_v38  ;;  %916 = vmatpush.msra.mxu0 %v741_v50 }
  0xdc   :  { %957 = vmatpush.msra.mxu1 %v1458_v22  ;;  %920 = vmatpush.msra.mxu0 %v747_v57 }
  0xde   :  { %959 = vmatpush.msra.mxu1 %v1468_v32  ;;  %924 = vmatpush.msra.mxu0 %v753_v18 }
  0xe0   :  { %961 = vmatpush.msra.mxu1 %v1470_v34  ;;  %928 = vmatpush.msra.mxu0 %v759_v21 }
  0xe2   :  { %963 = vmatpush.msra.mxu1 %v1521_v10  ;;  %932 = vmatpush.msra.mxu0 %v765_v53 }
  0xe4   :  { %965 = vmatpush.msra.mxu1 %v1526_v39  ;;  %936 = vmatpush.msra.mxu0 %v771_v58 }
  0xe6   :  { %967 = vmatpush.msra.mxu1 %v1534_v55 }
  0xe8   :  { %969 = vmatpush.msra.mxu1 %v1546_v1 }
  0xea   :  { %971 = vmatpush.msra.mxu1 %v666_v46 }
  0xec   :  { %973 = vmatpush.msra.mxu1 %v668_v27 }
 0x12f   :  { %v469_v8 = vpop.f32.mrf.mxu0 }
 0x131   :  { %v508_v14 = vpop.f32.mrf.mxu1 }
 0x133   :  { %v415_v61 = vpop.f32.mrf.mxu3 }
 0x13b   :  { %v314_v62 = vpop.f32.mrf.mxu2  ;;  %v614_v26 = vpop.f32.mrf.mxu3 }
 0x13c   :  { %v315_v6 = vadd.f32 %v992_v59, %v314_v62 }
 0x13e   :  { %v416_v7 = vadd.f32 %v415_v61, %v315_v6 }
 0x140   :  { %v470_v13 = vadd.f32 %v469_v8, %v416_v7 }
 0x142   :  { %v509_v15 = vadd.f32 %v508_v14, %v470_v13 }
 0x143   :  { %v577_v25 = vpop.f32.mrf.mxu2 }
 0x144   :  { %v578_v33 = vadd.f32 %v577_v25, %v509_v15 }
 0x146   :  { %v615_v38 = vadd.f32 %v614_v26, %v578_v33 }
 0x148   :  { %996 = vtanh.f32 %v615_v38 }
 0x14e   :  { %v997_v42 = vpop.eup %996 }
 0x14f   :  { %v670_v43 = vand.u32 4294901760, %v997_v42 }
 0x151   :  { %776 = vmatmul.f32.vlgmr.msrb.gmra.mxu1 %v670_v43  ;;  %v671_v4 = vsub.f32 %v997_v42, %v670_v43 }
 0x153   :  { %830 = vmatmul.f32.vlgmr.msrb.gmra.mxu2 %v671_v4  ;;  %v672_v44 = vand.u32 4294901760, %v671_v4 }
 0x155   :  { %869 = vmatmul.f32.vlgmr.msrb.gmra.mxu3 %v672_v44  ;;  %v673_v48 = vsub.f32 %v671_v4, %v672_v44 }
 0x157   :  { %v674_v5 = vand.u32 4294901760, %v673_v48 }
 0x159   :  { %675 = vmatmul.f32.vlgmr.msrb.gmra.mxu0 %v674_v5  ;;  %975 = vmatmul.f32.vlgmr.msra.gmra.mxu1 %v670_v43 }
 0x161   :  { %938 = vmatmul.f32.vlgmr.msra.gmra.mxu0 %v670_v43 }
 0x1ce   :  { %v777_v22 = vpop.f32.mrf.mxu1 }
 0x1d6   :  { %v676_v24 = vpop.f32.mrf.mxu0  ;;  %v831_v34 = vpop.f32.mrf.mxu2 }
 0x1d7   :  { %v677_v31 = vadd.f32 %v993_v56, %v676_v24  ;;  %v976_v10 = vpop.f32.mrf.mxu1 }
 0x1d8   :  { %v870_v41 = vpop.f32.mrf.mxu3 }
 0x1d9   :  { %v778_v32 = vadd.f32 %v777_v22, %v677_v31 }
 0x1db   :  { %v832_v40 = vadd.f32 %v831_v34, %v778_v32 }
 0x1dd   :  { %v871_v45 = vadd.f32 %v870_v41, %v832_v40 }
 0x1de   :  { %v939_v19 = vpop.f32.mrf.mxu0 }
 0x1df   :  { %v940_v28 = vadd.f32 %v939_v19, %v871_v45 }
 0x1e1   :  { %v977_v16 = vadd.f32 %v976_v10, %v940_v28 }
 0x1e3   :  { %979 = vst [vmem:[%s1600_s3] sm:$0xff] %v977_v16 }
 0x1e4   :  { %984 = vsyncpa [#allocation3], 1 }
 0x1e5   :  { %985 = vsyncpa [#allocation5], 1 }

</bundles_post_ra>
